<compile_context>
chip_gen: v7x
topology: tpu7x:2x2x1
jax: 0.10.0
libtpu: 0.0.40
codegen_flags: <defaults>
</compile_context>

<pallas_src>
import functools

import jax
import jax.numpy as jnp
import numpy as np
from jax import lax
from jax.experimental import pallas as pl
from jax.experimental.pallas import tpu as pltpu

# Deterministic "module parameters" (the module's __init__ args / fixed weights).
PRE_FILT = (-0.95, 1.0)   # pre-emphasis filter, length 2 -> zPad = 1
LP = True                 # apply the fixed [0.85, 1] low-pass conv
EPSILON = 1e-5

_LANES = 128
_DEFAULT_TILE_ROWS = 2048           # 2048*128*4B = 1 MiB f32 block per input
_MAX_TILE_ROWS = 4096
_VMEM_LIMIT_BYTES = 48 * 1024 * 1024


def _cdiv(a, b):
    return -(-a // b)


def _round_up(v, m):
    return ((v + m - 1) // m) * m


def _esr_kernel(x_ref, y_ref, xhalo_ref, yhalo_ref, acc_d_ref, acc_y_ref,
                cd_ref, cy_ref, *, batch, taps, lp, tile_rows, tiles_per_core,
                num_real_tiles, ragged_tail, has_phantom, tail_valid):
    c = pl.program_id(0)               # core (parallel axis)
    k = pl.program_id(1)               # tile within the core (arbitrary axis)
    gt = c * tiles_per_core + k        # global tile index

    x = x_ref[...].astype(jnp.float32)   # model output tile, (tile_rows, 128)
    y = y_ref[...].astype(jnp.float32)   # target tile
    d = y - x                            # filt(tgt) - filt(out) == filt(d)

    @pl.when(k == 0)
    def _init():
        acc_d_ref[...] = jnp.zeros_like(acc_d_ref)
        acc_y_ref[...] = jnp.zeros_like(acc_y_ref)
        # First-tile halo for this core: zeros on core 0 (== the module's zero
        # pad), the flat row just before this core's region otherwise.
        cd_ref[...] = yhalo_ref[0:1, :] - xhalo_ref[0:1, :]
        cy_ref[...] = yhalo_ref[0:1, :]

    cd = cd_ref[...]   # (1, 128): last flat row of the previous tile
    cy = cy_ref[...]
    # Carry this tile's last row to the next grid step (read-before-write above).
    cd_ref[...] = d[tile_rows - 1:, :]
    cy_ref[...] = y[tile_rows - 1:, :]

    def filt(v, carry_row):
        # `prev` = the flat signal shifted back by one full row (128 samples);
        # hoisted once and shared by both taps (single sublane-shift XLU pass).
        prev = jnp.concatenate([carry_row, v[:tile_rows - 1, :]], axis=0)

        def back(s):   # flat shift-back by s positions, 0 < s <= 128
            if s == _LANES:
                return prev
            # NOTE: pltpu.roll(v/prev, s, axis=1) + a lane-iota select is the
            # XLU-pinned alternative for this lane splice.
            return jnp.concatenate([prev[:, _LANES - s:], v[:, :_LANES - s]],
                                   axis=1)

        if lp:
            c0, c1, c2 = taps           # coefficients on x[t-2], x[t-1], x[t]
            return c0 * back(2 * batch) + c1 * back(batch) + c2 * v
        c1, c2 = taps                   # coefficients on x[t-1], x[t]
        return c1 * back(batch) + c2 * v

    hd = filt(d, cd)
    hy = filt(y, cy)
    sq_d = hd * hd
    sq_y = hy * hy

    def fold8(a):   # (tile_rows, 128) -> (8, 128): pure vreg-wise VPU adds
        return jnp.sum(a.reshape(tile_rows // 8, 8, _LANES), axis=0)

    def accumulate(mask_tail):
        sd, sy = sq_d, sq_y
        if mask_tail:
            # Last real tile: drop lane-pad zeros / ragged-block garbage.
            row = lax.broadcasted_iota(jnp.int32, (tile_rows, _LANES), 0)
            col = lax.broadcasted_iota(jnp.int32, (tile_rows, _LANES), 1)
            valid = (row * _LANES + col) < tail_valid
            sd = jnp.where(valid, sd, 0.0)   # where (not *): OOB may be NaN/Inf
            sy = jnp.where(valid, sy, 0.0)
        acc_d_ref[...] = acc_d_ref[...] + fold8(sd)
        acc_y_ref[...] = acc_y_ref[...] + fold8(sy)

    if ragged_tail:
        @pl.when(gt < num_real_tiles - 1)
        def _():
            accumulate(False)

        @pl.when(gt == num_real_tiles - 1)
        def _():
            accumulate(True)
    elif has_phantom:
        @pl.when(gt < num_real_tiles)
        def _():
            accumulate(False)
    else:
        accumulate(False)

    if lp:
        # h[t=0] == g[-1] does not exist in the (length T-1) low-passed output:
        # remove the first `batch` flat positions' contribution (global tile 0).
        @pl.when(gt == 0)
        def _head_fix():
            lane = lax.broadcasted_iota(jnp.int32, (1, _LANES), 1)
            head = lane < batch
            acc_d_ref[0:1, :] = acc_d_ref[0:1, :] - jnp.where(head, sq_d[0:1, :], 0.0)
            acc_y_ref[0:1, :] = acc_y_ref[0:1, :] - jnp.where(head, sq_y[0:1, :], 0.0)


def esr_loss_pre_emph(output, target, *, pre_filt=PRE_FILT, lp=LP,
                      epsilon=EPSILON, tile_rows=_DEFAULT_TILE_ROWS,
                      num_cores=2):
    """output, target: (T, B, 1) float — same convention as the PyTorch module."""
    assert output.shape == target.shape and output.ndim == 3
    T, B = output.shape[0], output.shape[1]
    if lp:
        # TODO(synk): batch > 64 would need a 2-row carried halo.
        assert 2 * B <= _LANES
    else:
        assert B <= _LANES

    # bf16/f16/f32 accepted natively (kernel upcasts); anything else -> f32.
    if (output.dtype != target.dtype
            or not jnp.issubdtype(output.dtype, jnp.floating)
            or output.dtype.itemsize not in (2, 4)):
        output = output.astype(jnp.float32)
        target = target.astype(jnp.float32)
    itemsize = output.dtype.itemsize
    sub = 8 if itemsize == 4 else 16    # native sublane tiling of the dtype

    p0, p1 = float(pre_filt[0]), float(pre_filt[1])
    taps = (0.85 * p0, 0.85 * p1 + p0, p1) if lp else (p0, p1)

    # Flatten time-major: flat[t*B + b] = x[t, b] (pure contiguous reshape).
    xo = output.reshape(-1)
    xt = target.reshape(-1)
    n = T * B
    rows = _cdiv(n, _LANES)

    # Tile selection: ~1 MiB blocks by default, never larger than the array.
    want = max(sub, min(_round_up(int(tile_rows), sub), _MAX_TILE_ROWS))
    if rows <= want:
        tile = _round_up(rows, sub)     # single tile covering everything
        rows_pad = tile
    else:
        tile = want
        rows_pad = rows                 # last block ragged, masked in-kernel

    num_real = _cdiv(rows_pad, tile)
    ncores = max(1, min(int(num_cores), num_real))
    tpc = _cdiv(num_real, ncores)       # tiles per core
    has_phantom = ncores * tpc > num_real
    ragged_tail = n < num_real * tile * _LANES
    tail_valid = n - (num_real - 1) * tile * _LANES

    # Only the minimal lane pad copies the inputs (no pad-to-tile-alignment).
    n_pad = rows_pad * _LANES
    if n_pad != n:
        xo = jnp.pad(xo, (0, n_pad - n))
        xt = jnp.pad(xt, (0, n_pad - n))
    xo2 = xo.reshape(rows_pad, _LANES)
    xt2 = xt.reshape(rows_pad, _LANES)

    # Per-core first-tile halo rows (core 0: zeros; core c>0: boundary row).
    xhalo = jnp.zeros((ncores, 8, _LANES), jnp.float32)
    yhalo = jnp.zeros((ncores, 8, _LANES), jnp.float32)
    for c in range(1, ncores):
        b_row = min(c * tpc * tile - 1, rows_pad - 1)
        xhalo = xhalo.at[c, 0, :].set(xo2[b_row].astype(jnp.float32))
        yhalo = yhalo.at[c, 0, :].set(xt2[b_row].astype(jnp.float32))

    def data_map(c, k):
        gt = c * tpc + k
        if has_phantom:
            gt = jnp.minimum(gt, num_real - 1)   # clamp phantom tiles (skipped)
        return (gt, 0)

    halo_map = lambda c, k: (c, 0, 0)
    acc_map = lambda c, k: (c, 0, 0)             # per-core resident accumulator

    kernel = functools.partial(
        _esr_kernel, batch=B, taps=taps, lp=lp, tile_rows=tile,
        tiles_per_core=tpc, num_real_tiles=num_real, ragged_tail=ragged_tail,
        has_phantom=has_phantom, tail_valid=tail_valid)

    acc_d, acc_y = pl.pallas_call(
        kernel,
        grid=(ncores, tpc),
        in_specs=[pl.BlockSpec((tile, _LANES), data_map),
                  pl.BlockSpec((tile, _LANES), data_map),
                  pl.BlockSpec((None, 8, _LANES), halo_map),
                  pl.BlockSpec((None, 8, _LANES), halo_map)],
        out_specs=[pl.BlockSpec((None, 8, _LANES), acc_map),
                   pl.BlockSpec((None, 8, _LANES), acc_map)],
        out_shape=[jax.ShapeDtypeStruct((ncores, 8, _LANES), jnp.float32),
                   jax.ShapeDtypeStruct((ncores, 8, _LANES), jnp.float32)],
        scratch_shapes=[pltpu.VMEM((1, _LANES), jnp.float32),   # d halo row
                        pltpu.VMEM((1, _LANES), jnp.float32)],  # y halo row
        compiler_params=pltpu.CompilerParams(
            dimension_semantics=("parallel", "arbitrary"),
            vmem_limit_bytes=_VMEM_LIMIT_BYTES),
        cost_estimate=pl.CostEstimate(
            flops=16 * n,
            transcendentals=0,
            bytes_accessed=2 * n * itemsize + 2 * ncores * 8 * _LANES * 4),
    )(xo2, xt2, xhalo, yhalo)

    sum_d = jnp.sum(acc_d)
    sum_y = jnp.sum(acc_y)
    count = jnp.float32(B * (T - 1) if lp else B * T)
    return (sum_d / count) / (sum_y / count + jnp.float32(epsilon))


def esr_loss_ref(output, target, *, pre_filt=PRE_FILT, lp=LP, epsilon=EPSILON):
    """Pure-JAX reference of the PyTorch forward, for verification."""
    p0, p1 = pre_filt

    def filt(x):                               # x: (T, B, 1)
        x2 = x[..., 0].T.astype(jnp.float32)   # (B, T)
        xp = jnp.pad(x2, ((0, 0), (1, 0)))     # left zero-pad (zPad = 1)
        f = p0 * xp[:, :-1] + p1 * xp[:, 1:]
        if lp:
            f = 0.85 * f[:, :-1] + f[:, 1:]
        return f

    fo = filt(output)
    ft = filt(target)
    return jnp.mean((ft - fo) ** 2) / (jnp.mean(ft ** 2) + epsilon)


if __name__ == "__main__":
    key = jax.random.PRNGKey(0)
    k1, k2, k3, k4 = jax.random.split(key, 4)

    # Case 1: aligned, 4 tiles split over the 2-core grid (carried halo +
    # explicit cross-core boundary halo).
    T1, B1 = 1024, 8                        # 8192 flat -> 64 rows of 128 lanes
    out1 = jax.random.normal(k1, (T1, B1, 1), jnp.float32)
    tgt1 = jax.random.normal(k2, (T1, B1, 1), jnp.float32)
    l1 = jax.block_until_ready(esr_loss_pre_emph(out1, tgt1, tile_rows=16))
    np.testing.assert_allclose(np.asarray(l1), np.asarray(esr_loss_ref(out1, tgt1)),
                               rtol=1e-4, atol=1e-5)

    # Case 2: odd tile count -> one clamped phantom tile + ragged masked tail.
    T2, B2 = 640, 8                         # 5120 flat -> 40 rows, tiles of 16
    out2 = jax.random.normal(k3, (T2, B2, 1), jnp.float32)
    tgt2 = jax.random.normal(k4, (T2, B2, 1), jnp.float32)
    l2 = jax.block_until_ready(esr_loss_pre_emph(out2, tgt2, tile_rows=16))
    np.testing.assert_allclose(np.asarray(l2), np.asarray(esr_loss_ref(out2, tgt2)),
                               rtol=1e-4, atol=1e-5)

    # Case 3: T*B % 128 != 0 (minimal lane pad + masked tail), default tile size.
    T3, B3 = 1000, 3
    out3 = jax.random.normal(k1, (T3, B3, 1), jnp.float32)
    tgt3 = jax.random.normal(k2, (T3, B3, 1), jnp.float32)
    l3 = jax.block_until_ready(esr_loss_pre_emph(out3, tgt3))
    np.testing.assert_allclose(np.asarray(l3), np.asarray(esr_loss_ref(out3, tgt3)),
                               rtol=1e-4, atol=1e-5)

    # Case 4: lp=False branch (pre-emphasis filter only).
    l4 = jax.block_until_ready(esr_loss_pre_emph(out1, tgt1, lp=False, tile_rows=16))
    np.testing.assert_allclose(np.asarray(l4),
                               np.asarray(esr_loss_ref(out1, tgt1, lp=False)),
                               rtol=1e-4, atol=1e-5)

    # Case 5: bf16 activations (halved HBM traffic; f32 math inside the kernel).
    out5 = out1.astype(jnp.bfloat16)
    tgt5 = tgt1.astype(jnp.bfloat16)
    l5 = jax.block_until_ready(esr_loss_pre_emph(out5, tgt5, tile_rows=32))
    np.testing.assert_allclose(np.asarray(l5), np.asarray(esr_loss_ref(out5, tgt5)),
                               rtol=1e-4, atol=1e-5)

    print("KERNEL_OK")
</pallas_src>

<mosaic_0001>
module attributes {stable_mosaic.version = 11 : i64} {
  func.func @_esr_kernel(%arg0: i32, %arg1: i32, %arg2: memref<16x128xf32, #tpu.memory_space<vmem>>, %arg3: memref<16x128xf32, #tpu.memory_space<vmem>>, %arg4: memref<1x8x128xf32, #tpu.memory_space<vmem>>, %arg5: memref<1x8x128xf32, #tpu.memory_space<vmem>>, %arg6: memref<1x8x128xf32, #tpu.memory_space<vmem>>, %arg7: memref<1x8x128xf32, #tpu.memory_space<vmem>>, %arg8: memref<1x128xf32, #tpu.memory_space<vmem>>, %arg9: memref<1x128xf32, #tpu.memory_space<vmem>>) attributes {dimension_semantics = [#tpu.dimension_semantics<parallel>, #tpu.dimension_semantics<arbitrary>], iteration_bounds = array<i64: 2, 2>, scalar_prefetch = 0 : i64, scratch_operands = 2 : i64, tpu.core_type = #tpu.core_type<tc>, window_params = [{transform_indices = @transform_0, window_bounds = array<i64: 16, 128>}, {transform_indices = @transform_1, window_bounds = array<i64: 16, 128>}, {transform_indices = @transform_2, window_bounds = array<i64: 1, 8, 128>}, {transform_indices = @transform_3, window_bounds = array<i64: 1, 8, 128>}, {transform_indices = @transform_4, window_bounds = array<i64: 1, 8, 128>}, {transform_indices = @transform_5, window_bounds = array<i64: 1, 8, 128>}]} {
    %c2_i32 = arith.constant 2 : i32
    %0 = arith.muli %arg0, %c2_i32 : i32
    %1 = arith.addi %0, %arg1 : i32
    %c0 = arith.constant 0 : index
    %c0_0 = arith.constant 0 : index
    %2 = vector.load %arg2[%c0, %c0_0] : memref<16x128xf32, #tpu.memory_space<vmem>>, vector<16x128xf32>
    %c0_1 = arith.constant 0 : index
    %c0_2 = arith.constant 0 : index
    %3 = vector.load %arg3[%c0_1, %c0_2] : memref<16x128xf32, #tpu.memory_space<vmem>>, vector<16x128xf32>
    %4 = arith.subf %3, %2 : vector<16x128xf32>
    %c0_i32 = arith.constant 0 : i32
    %5 = arith.cmpi eq, %arg1, %c0_i32 : i32
    %6 = arith.extui %5 : i1 to i32
    %c0_i32_3 = arith.constant 0 : i32
    %7 = arith.cmpi ne, %6, %c0_i32_3 : i32
    scf.if %7 {
      %cst_33 = arith.constant 0.000000e+00 : f32
      %67 = vector.broadcast %cst_33 : f32 to vector<8x128xf32>
      %c0_34 = arith.constant 0 : index
      %c0_35 = arith.constant 0 : index
      %c0_36 = arith.constant 0 : index
      %68 = vector.load %arg6[%c0_34, %c0_35, %c0_36] : memref<1x8x128xf32, #tpu.memory_space<vmem>>, vector<1x8x128xf32>
      %69 = vector.shape_cast %68 : vector<1x8x128xf32> to vector<8x128xf32>
      %70 = vector.shape_cast %67 : vector<8x128xf32> to vector<1x8x128xf32>
      tpu.vector_store %arg6[%c0_34, %c0_35, %c0_36], %70 {strides = array<i32>} : memref<1x8x128xf32, #tpu.memory_space<vmem>>, vector<1x8x128xf32>,
      %cst_37 = arith.constant 0.000000e+00 : f32
      %71 = vector.broadcast %cst_37 : f32 to vector<8x128xf32>
      %c0_38 = arith.constant 0 : index
      %c0_39 = arith.constant 0 : index
      %c0_40 = arith.constant 0 : index
      %72 = vector.load %arg7[%c0_38, %c0_39, %c0_40] : memref<1x8x128xf32, #tpu.memory_space<vmem>>, vector<1x8x128xf32>
      %73 = vector.shape_cast %72 : vector<1x8x128xf32> to vector<8x128xf32>
      %74 = vector.shape_cast %71 : vector<8x128xf32> to vector<1x8x128xf32>
      tpu.vector_store %arg7[%c0_38, %c0_39, %c0_40], %74 {strides = array<i32>} : memref<1x8x128xf32, #tpu.memory_space<vmem>>, vector<1x8x128xf32>,
      %c0_41 = arith.constant 0 : index
      %c0_42 = arith.constant 0 : index
      %c0_43 = arith.constant 0 : index
      %75 = vector.load %arg5[%c0_41, %c0_42, %c0_43] : memref<1x8x128xf32, #tpu.memory_space<vmem>>, vector<1x1x128xf32>
      %76 = vector.shape_cast %75 : vector<1x1x128xf32> to vector<1x128xf32>
      %c0_44 = arith.constant 0 : index
      %c0_45 = arith.constant 0 : index
      %c0_46 = arith.constant 0 : index
      %77 = vector.load %arg4[%c0_44, %c0_45, %c0_46] : memref<1x8x128xf32, #tpu.memory_space<vmem>>, vector<1x1x128xf32>
      %78 = vector.shape_cast %77 : vector<1x1x128xf32> to vector<1x128xf32>
      %79 = arith.subf %76, %78 : vector<1x128xf32>
      %c0_47 = arith.constant 0 : index
      %c0_48 = arith.constant 0 : index
      %80 = vector.load %arg8[%c0_47, %c0_48] : memref<1x128xf32, #tpu.memory_space<vmem>>, vector<1x128xf32>
      tpu.vector_store %arg8[%c0_47, %c0_48], %79 {strides = array<i32>} : memref<1x128xf32, #tpu.memory_space<vmem>>, vector<1x128xf32>,
      %c0_49 = arith.constant 0 : index
      %c0_50 = arith.constant 0 : index
      %c0_51 = arith.constant 0 : index
      %81 = vector.load %arg5[%c0_49, %c0_50, %c0_51] : memref<1x8x128xf32, #tpu.memory_space<vmem>>, vector<1x1x128xf32>
      %82 = vector.shape_cast %81 : vector<1x1x128xf32> to vector<1x128xf32>
      %c0_52 = arith.constant 0 : index
      %c0_53 = arith.constant 0 : index
      %83 = vector.load %arg9[%c0_52, %c0_53] : memref<1x128xf32, #tpu.memory_space<vmem>>, vector<1x128xf32>
      tpu.vector_store %arg9[%c0_52, %c0_53], %82 {strides = array<i32>} : memref<1x128xf32, #tpu.memory_space<vmem>>, vector<1x128xf32>,
    } else {
    }
    %c0_4 = arith.constant 0 : index
    %c0_5 = arith.constant 0 : index
    %8 = vector.load %arg8[%c0_4, %c0_5] : memref<1x128xf32, #tpu.memory_space<vmem>>, vector<1x128xf32>
    %c0_6 = arith.constant 0 : index
    %c0_7 = arith.constant 0 : index
    %9 = vector.load %arg9[%c0_6, %c0_7] : memref<1x128xf32, #tpu.memory_space<vmem>>, vector<1x128xf32>
    %10 = vector.extract_strided_slice %4 {offsets = [15, 0], sizes = [1, 128], strides = [1, 1]} : vector<16x128xf32> to vector<1x128xf32>
    %c0_8 = arith.constant 0 : index
    %c0_9 = arith.constant 0 : index
    %11 = vector.load %arg8[%c0_8, %c0_9] : memref<1x128xf32, #tpu.memory_space<vmem>>, vector<1x128xf32>
    tpu.vector_store %arg8[%c0_8, %c0_9], %10 {strides = array<i32>} : memref<1x128xf32, #tpu.memory_space<vmem>>, vector<1x128xf32>,
    %12 = vector.extract_strided_slice %3 {offsets = [15, 0], sizes = [1, 128], strides = [1, 1]} : vector<16x128xf32> to vector<1x128xf32>
    %c0_10 = arith.constant 0 : index
    %c0_11 = arith.constant 0 : index
    %13 = vector.load %arg9[%c0_10, %c0_11] : memref<1x128xf32, #tpu.memory_space<vmem>>, vector<1x128xf32>
    tpu.vector_store %arg9[%c0_10, %c0_11], %12 {strides = array<i32>} : memref<1x128xf32, #tpu.memory_space<vmem>>, vector<1x128xf32>,
    %14 = vector.extract_strided_slice %4 {offsets = [0, 0], sizes = [15, 128], strides = [1, 1]} : vector<16x128xf32> to vector<15x128xf32>
    %15 = tpu.concatenate %8, %14 in 0 : vector<1x128xf32>, vector<15x128xf32> -> vector<16x128xf32>
    %16 = vector.extract_strided_slice %15 {offsets = [0, 112], sizes = [16, 16], strides = [1, 1]} : vector<16x128xf32> to vector<16x16xf32>
    %17 = vector.extract_strided_slice %4 {offsets = [0, 0], sizes = [16, 112], strides = [1, 1]} : vector<16x128xf32> to vector<16x112xf32>
    %18 = tpu.concatenate %16, %17 in 1 : vector<16x16xf32>, vector<16x112xf32> -> vector<16x128xf32>
    %cst = arith.constant -8.075000e-01 : f32
    %19 = vector.broadcast %cst : f32 to vector<16x128xf32>
    %20 = arith.mulf %19, %18 : vector<16x128xf32>
    %21 = vector.extract_strided_slice %15 {offsets = [0, 120], sizes = [16, 8], strides = [1, 1]} : vector<16x128xf32> to vector<16x8xf32>
    %22 = vector.extract_strided_slice %4 {offsets = [0, 0], sizes = [16, 120], strides = [1, 1]} : vector<16x128xf32> to vector<16x120xf32>
    %23 = tpu.concatenate %21, %22 in 1 : vector<16x8xf32>, vector<16x120xf32> -> vector<16x128xf32>
    %cst_12 = arith.constant -1.000000e-01 : f32
    %24 = vector.broadcast %cst_12 : f32 to vector<16x128xf32>
    %25 = arith.mulf %24, %23 : vector<16x128xf32>
    %26 = arith.addf %20, %25 : vector<16x128xf32>
    %cst_13 = arith.constant 1.000000e+00 : f32
    %27 = vector.broadcast %cst_13 : f32 to vector<16x128xf32>
    %28 = arith.mulf %27, %4 : vector<16x128xf32>
    %29 = arith.addf %26, %28 : vector<16x128xf32>
    %30 = vector.extract_strided_slice %3 {offsets = [0, 0], sizes = [15, 128], strides = [1, 1]} : vector<16x128xf32> to vector<15x128xf32>
    %31 = tpu.concatenate %9, %30 in 0 : vector<1x128xf32>, vector<15x128xf32> -> vector<16x128xf32>
    %32 = vector.extract_strided_slice %31 {offsets = [0, 112], sizes = [16, 16], strides = [1, 1]} : vector<16x128xf32> to vector<16x16xf32>
    %33 = vector.extract_strided_slice %3 {offsets = [0, 0], sizes = [16, 112], strides = [1, 1]} : vector<16x128xf32> to vector<16x112xf32>
    %34 = tpu.concatenate %32, %33 in 1 : vector<16x16xf32>, vector<16x112xf32> -> vector<16x128xf32>
    %cst_14 = arith.constant -8.075000e-01 : f32
    %35 = vector.broadcast %cst_14 : f32 to vector<16x128xf32>
    %36 = arith.mulf %35, %34 : vector<16x128xf32>
    %37 = vector.extract_strided_slice %31 {offsets = [0, 120], sizes = [16, 8], strides = [1, 1]} : vector<16x128xf32> to vector<16x8xf32>
    %38 = vector.extract_strided_slice %3 {offsets = [0, 0], sizes = [16, 120], strides = [1, 1]} : vector<16x128xf32> to vector<16x120xf32>
    %39 = tpu.concatenate %37, %38 in 1 : vector<16x8xf32>, vector<16x120xf32> -> vector<16x128xf32>
    %cst_15 = arith.constant -1.000000e-01 : f32
    %40 = vector.broadcast %cst_15 : f32 to vector<16x128xf32>
    %41 = arith.mulf %40, %39 : vector<16x128xf32>
    %42 = arith.addf %36, %41 : vector<16x128xf32>
    %cst_16 = arith.constant 1.000000e+00 : f32
    %43 = vector.broadcast %cst_16 : f32 to vector<16x128xf32>
    %44 = arith.mulf %43, %3 : vector<16x128xf32>
    %45 = arith.addf %42, %44 : vector<16x128xf32>
    %46 = arith.mulf %29, %29 : vector<16x128xf32>
    %47 = arith.mulf %45, %45 : vector<16x128xf32>
    %c0_17 = arith.constant 0 : index
    %c0_18 = arith.constant 0 : index
    %c0_19 = arith.constant 0 : index
    %48 = vector.load %arg6[%c0_17, %c0_18, %c0_19] : memref<1x8x128xf32, #tpu.memory_space<vmem>>, vector<1x8x128xf32>
    %49 = vector.shape_cast %48 : vector<1x8x128xf32> to vector<8x128xf32>
    %50 = vector.shape_cast %46 : vector<16x128xf32> to vector<2x8x128xf32>
    %cst_20 = arith.constant dense<0.000000e+00> : vector<8x128xf32>
    %51 = vector.multi_reduction <add>, %50, %cst_20 [0] : vector<2x8x128xf32> to vector<8x128xf32>
    %52 = arith.addf %49, %51 : vector<8x128xf32>
    %c0_21 = arith.constant 0 : index
    %c0_22 = arith.constant 0 : index
    %c0_23 = arith.constant 0 : index
    %53 = vector.load %arg6[%c0_21, %c0_22, %c0_23] : memref<1x8x128xf32, #tpu.memory_space<vmem>>, vector<1x8x128xf32>
    %54 = vector.shape_cast %53 : vector<1x8x128xf32> to vector<8x128xf32>
    %55 = vector.shape_cast %52 : vector<8x128xf32> to vector<1x8x128xf32>
    tpu.vector_store %arg6[%c0_21, %c0_22, %c0_23], %55 {strides = array<i32>} : memref<1x8x128xf32, #tpu.memory_space<vmem>>, vector<1x8x128xf32>,
    %c0_24 = arith.constant 0 : index
    %c0_25 = arith.constant 0 : index
    %c0_26 = arith.constant 0 : index
    %56 = vector.load %arg7[%c0_24, %c0_25, %c0_26] : memref<1x8x128xf32, #tpu.memory_space<vmem>>, vector<1x8x128xf32>
    %57 = vector.shape_cast %56 : vector<1x8x128xf32> to vector<8x128xf32>
    %58 = vector.shape_cast %47 : vector<16x128xf32> to vector<2x8x128xf32>
    %cst_27 = arith.constant dense<0.000000e+00> : vector<8x128xf32>
    %59 = vector.multi_reduction <add>, %58, %cst_27 [0] : vector<2x8x128xf32> to vector<8x128xf32>
    %60 = arith.addf %57, %59 : vector<8x128xf32>
    %c0_28 = arith.constant 0 : index
    %c0_29 = arith.constant 0 : index
    %c0_30 = arith.constant 0 : index
    %61 = vector.load %arg7[%c0_28, %c0_29, %c0_30] : memref<1x8x128xf32, #tpu.memory_space<vmem>>, vector<1x8x128xf32>
    %62 = vector.shape_cast %61 : vector<1x8x128xf32> to vector<8x128xf32>
    %63 = vector.shape_cast %60 : vector<8x128xf32> to vector<1x8x128xf32>
    tpu.vector_store %arg7[%c0_28, %c0_29, %c0_30], %63 {strides = array<i32>} : memref<1x8x128xf32, #tpu.memory_space<vmem>>, vector<1x8x128xf32>,
    %c0_i32_31 = arith.constant 0 : i32
    %64 = arith.cmpi eq, %1, %c0_i32_31 : i32
    %65 = arith.extui %64 : i1 to i32
    %c0_i32_32 = arith.constant 0 : i32
    %66 = arith.cmpi ne, %65, %c0_i32_32 : i32
    scf.if %66 {
      %67 = tpu.iota {dimensions = array<i32: 1>} : vector<1x128xi32>
      %c8_i32 = arith.constant 8 : i32
      %68 = vector.broadcast %c8_i32 : i32 to vector<1x128xi32>
      %69 = arith.cmpi slt, %67, %68 : vector<1x128xi32>
      %c0_33 = arith.constant 0 : index
      %c0_34 = arith.constant 0 : index
      %c0_35 = arith.constant 0 : index
      %70 = vector.load %arg6[%c0_33, %c0_34, %c0_35] : memref<1x8x128xf32, #tpu.memory_space<vmem>>, vector<1x1x128xf32>
      %71 = vector.shape_cast %70 : vector<1x1x128xf32> to vector<1x128xf32>
      %72 = vector.extract_strided_slice %46 {offsets = [0, 0], sizes = [1, 128], strides = [1, 1]} : vector<16x128xf32> to vector<1x128xf32>
      %cst_36 = arith.constant 0.000000e+00 : f32
      %73 = vector.broadcast %cst_36 : f32 to vector<1x128xf32>
      %74 = arith.select %69, %72, %73 : vector<1x128xi1>, vector<1x128xf32>
      %75 = arith.subf %71, %74 : vector<1x128xf32>
      %c0_37 = arith.constant 0 : index
      %c0_38 = arith.constant 0 : index
      %c0_39 = arith.constant 0 : index
      %76 = vector.load %arg6[%c0_37, %c0_38, %c0_39] : memref<1x8x128xf32, #tpu.memory_space<vmem>>, vector<1x1x128xf32>
      %77 = vector.shape_cast %76 : vector<1x1x128xf32> to vector<1x128xf32>
      %78 = vector.shape_cast %75 : vector<1x128xf32> to vector<1x1x128xf32>
      tpu.vector_store %arg6[%c0_37, %c0_38, %c0_39], %78 {strides = array<i32>} : memref<1x8x128xf32, #tpu.memory_space<vmem>>, vector<1x1x128xf32>,
      %c0_40 = arith.constant 0 : index
      %c0_41 = arith.constant 0 : index
      %c0_42 = arith.constant 0 : index
      %79 = vector.load %arg7[%c0_40, %c0_41, %c0_42] : memref<1x8x128xf32, #tpu.memory_space<vmem>>, vector<1x1x128xf32>
      %80 = vector.shape_cast %79 : vector<1x1x128xf32> to vector<1x128xf32>
      %81 = vector.extract_strided_slice %47 {offsets = [0, 0], sizes = [1, 128], strides = [1, 1]} : vector<16x128xf32> to vector<1x128xf32>
      %cst_43 = arith.constant 0.000000e+00 : f32
      %82 = vector.broadcast %cst_43 : f32 to vector<1x128xf32>
      %83 = arith.select %69, %81, %82 : vector<1x128xi1>, vector<1x128xf32>
      %84 = arith.subf %80, %83 : vector<1x128xf32>
      %c0_44 = arith.constant 0 : index
      %c0_45 = arith.constant 0 : index
      %c0_46 = arith.constant 0 : index
      %85 = vector.load %arg7[%c0_44, %c0_45, %c0_46] : memref<1x8x128xf32, #tpu.memory_space<vmem>>, vector<1x1x128xf32>
      %86 = vector.shape_cast %85 : vector<1x1x128xf32> to vector<1x128xf32>
      %87 = vector.shape_cast %84 : vector<1x128xf32> to vector<1x1x128xf32>
      tpu.vector_store %arg7[%c0_44, %c0_45, %c0_46], %87 {strides = array<i32>} : memref<1x8x128xf32, #tpu.memory_space<vmem>>, vector<1x1x128xf32>,
    } else {
    }
    return
  }
  func.func @transform_0(%arg0: i32, %arg1: i32) -> (i32, i32) {
    %c2_i32 = arith.constant 2 : i32
    %0 = arith.muli %arg0, %c2_i32 : i32
    %1 = arith.addi %0, %arg1 : i32
    %c0_i32 = arith.constant 0 : i32
    %c0_i32_0 = arith.constant 0 : i32
    return %1, %c0_i32 : i32, i32
  }
  func.func @transform_1(%arg0: i32, %arg1: i32) -> (i32, i32) {
    %c2_i32 = arith.constant 2 : i32
    %0 = arith.muli %arg0, %c2_i32 : i32
    %1 = arith.addi %0, %arg1 : i32
    %c0_i32 = arith.constant 0 : i32
    %c0_i32_0 = arith.constant 0 : i32
    return %1, %c0_i32 : i32, i32
  }
  func.func @transform_2(%arg0: i32, %arg1: i32) -> (i32, i32, i32) {
    %c0_i32 = arith.constant 0 : i32
    %c0_i32_0 = arith.constant 0 : i32
    %c0_i32_1 = arith.constant 0 : i32
    return %arg0, %c0_i32, %c0_i32_0 : i32, i32, i32
  }
  func.func @transform_3(%arg0: i32, %arg1: i32) -> (i32, i32, i32) {
    %c0_i32 = arith.constant 0 : i32
    %c0_i32_0 = arith.constant 0 : i32
    %c0_i32_1 = arith.constant 0 : i32
    return %arg0, %c0_i32, %c0_i32_0 : i32, i32, i32
  }
  func.func @transform_4(%arg0: i32, %arg1: i32) -> (i32, i32, i32) {
    %c0_i32 = arith.constant 0 : i32
    %c0_i32_0 = arith.constant 0 : i32
    %c0_i32_1 = arith.constant 0 : i32
    return %arg0, %c0_i32, %c0_i32_0 : i32, i32, i32
  }
  func.func @transform_5(%arg0: i32, %arg1: i32) -> (i32, i32, i32) {
    %c0_i32 = arith.constant 0 : i32
    %c0_i32_0 = arith.constant 0 : i32
    %c0_i32_1 = arith.constant 0 : i32
    return %arg0, %c0_i32, %c0_i32_0 : i32, i32, i32
  }
}

</mosaic_0001>

<bundles_post_ra>
// kernel: tpu_custom_call.1
= control target key start
LH: loop header
LB: loop body
LE: loop exit
PB: predicated region body
PF: predicated region fallthrough
CT: control target
= control target key end

     0   :  { %s1721_s0 = inlined_call_operand.hbm [shape: f32[64,128], index: 0, kind: input, shape index: {}]   ;;  %s1722_s1 = inlined_call_operand.hbm [shape: f32[64,128], index: 1, kind: input, shape index: {}]   ;;  %s1723_s2 = inlined_call_operand.hbm [shape: f32[2,8,128], index: 2, kind: input, shape index: {}]   ;;  %s1724_s3 = inlined_call_operand.hbm [shape: f32[2,8,128], index: 3, kind: input, shape index: {}]   ;;  %s1725_s4 = inlined_call_operand.hbm [shape: f32[2,8,128], index: 4, kind: output, shape index: {0}]   ;;  %s1726_s5 = inlined_call_operand.hbm [shape: f32[2,8,128], index: 5, kind: output, shape index: {1}]  }
   0x1   :  { %1742 = sst [smem:[#allocation27_spill]] %s1721_s0 }
   0x2   :  { %1743 = sst [smem:[#allocation28_spill]] %s1722_s1 }
   0x3   :  { %1744 = sst [smem:[#allocation29_spill]] %s1723_s2 }
   0x4   :  { %11 = vsyncpa [#allocation5], 0 }
   0x5   :  { %13 = vsyncpa [#allocation5 + $0x1], 0 }
   0x6   :  { %14 = vsyncpa [#allocation8], 0 }
   0x7   :  { %16 = vsyncpa [#allocation8 + $0x1], 0 }
   0x8   :  { %17 = vsyncpa [#allocation11], 0 }
   0x9   :  { %19 = vsyncpa [#allocation11 + $0x1], 0 }
   0xa   :  { %20 = vsyncpa [#allocation6], 0 }
   0xb   :  { %22 = vsyncpa [#allocation6 + $0x1], 0 }
   0xc   :  { %23 = vsyncpa [#allocation14], 0 }
   0xd   :  { %25 = vsyncpa [#allocation14 + $0x1], 0  ;;  %s1246_s18 = smov 0   ;;  %s1248_s19 = smov 0  }
   0xe   :  { %s1250_s20 = smov 0   ;;  %s1252_s21 = smov 0  }
   0xf   :  { %s1254_s22 = smov 0   ;;  %s1256_s23 = smov 0  }
  0x10   :  { %s1258_s24 = smov 0   ;;  %s1260_s25 = smov 0  }
  0x11   :  { %s1262_s26 = smov 0   ;;  %s1264_s27 = smov 0  }
  0x12   :  { %s1266_s28 = smov 0  }
  0x13 LB: > { %1745 = sst [smem:[#allocation21_spill]] %s1183_s23  ;;  %s40_s29 = sadd.s32 1, %s1195_s26  ;;  %s1203_s28 = sphi %s1266_s28, %s31_s28   ;;  %s1199_s27 = sphi %s1264_s27, %s1790_s27   ;;  %s1195_s26 = sphi %s1262_s26, %s1782_s26   ;;  %s1191_s25 = sphi %s1260_s25, %s1789_s25   ;;  %s1187_s24 = sphi %s1258_s24, %s1781_s24   ;;  %s1183_s23 = sphi %s1256_s23, %s1780_s23   ;;  %s1179_s22 = sphi %s1254_s22, %s1788_s22   ;;  %s1175_s21 = sphi %s1252_s21, %s1787_s21   ;;  %s1171_s20 = sphi %s1250_s20, %s1786_s20   ;;  %s1167_s19 = sphi %s1248_s19, %s1785_s19   ;;  %s1163_s18 = sphi %s1246_s18, %s1784_s18  }
  0x14   : > { %1746 = sst [smem:[#allocation22_spill]] %s1195_s26  ;;  %s43_s30 = sadd.s32 1, %s1199_s27 }
  0x15   : > { %p41_p0 = scmp.ge.s32.totalorder %s40_s29, 2  ;;  %s754_s6 = sshll.u32 %s1199_s27, 1 }
  0x16   : > { %s1305_s7 = sadd.s32 %s1195_s26, %s754_s6  ;;  %s54_s8 = sadd.s32 1, %s1183_s23 }
  0x17   : > { %s1792_s29 = smov (%p41_p0, %s40_s29), 0  ;;  %s1794_s30 = smov (!%p41_p0, %s43_s30), %s1199_s27 }
  0x18   : > { %1747 = sst [smem:[#allocation23_spill]] %s1792_s29  ;;  %p61_p1 = scmp.ne.s32.totalorder %s1183_s23, %s1179_s22 }
  0x19   : > { %p1733_p2 = scmp.eq.s32.totalorder %s1203_s28, 0  ;;  %p45_p3 = scmp.ge.s32.totalorder %s1794_s30, 2 }
  0x1a   : > { %p1732_p6 = scmp.lt.s32.totalorder %s1203_s28, 4  ;;  %s1728_s9 = sand.u32 1, %s1183_s23  }
  0x1b   : > { %p63_p5 = por %p1733_p2, %p61_p1  ;;  %s1796_s30 = smov (%p45_p3, %s1794_s30), 0 }
  0x1c   : > { %1748 = sst [smem:[#allocation24_spill]] %s1796_s30  ;;  %s755_s10 = sshll.u32 %s1796_s30, 1 }
  0x1d   : > { %s107_s11 = ssub.s32 %s1199_s27, %s1796_s30  ;;  %s50_s12 = sadd.s32 %s755_s10, %s1792_s29 }
  0x1e   : > { %p1326_p7 = scmp.eq.s32.totalorder %s107_s11, 0  ;;  %s51_s14 = ssub.s32 %s1305_s7, %s50_s12 }
  0x1f   : > { %s1333_s15 = sshll.u32 %s1728_s9, 4  ;;  %p52_p8 = scmp.eq.s32.totalorder %s51_s14, 0 }
  0x20   : > { %s1730_s16 = sshll.u32 %s1305_s7, 8  ;;  %p1338_p9 = pnand %p1732_p6, %p63_p5 }
  0x21   : > { %s1343_s6 = scalar_select %p52_p8, %s1183_s23, %s54_s8  }
  0x22   : > { %s248_s10 = sand.u32 1, %s1203_s28   ;;  %s1752_s1 = sld [smem:[#allocation28_spill]] }
  0x23   : > { %1751 = sst [smem:[#allocation25_spill]] %s1343_s6  ;;  %s252_s14 = scalar_lea.vmem [#allocation7], %s1333_s15 }
  0x24   : > { %s261_s9 = sshll.u32 %s252_s14, 4  ;;  %s1358_s29 = scalar_lea.sflag [#allocation8], %s248_s10  ;;  %s1355_s9 = int_to_ptr.vmem [resolvable:$true] %s261_s9 }
  0x25   : > { %p919_p13 = pneg %p1338_p9 }
  0x28   : > { %s1351_s12 = scalar_lea.hbm %s1752_s1, %s1730_s16  ;;  %s922_s16 = scalar_lea.hbm %s1752_s1, 1024 }
  0x29   : > { %s917_s8 = scalar_lea.hbm %s1351_s12, 256  ;;  %p923_p3 = scmp.lt.u32.totalorder %s1351_s12, %s1752_s1 }
  0x2a   : > { %p918_p12 = scmp.ne.s32.totalorder %s1351_s12, %s917_s8  ;;  %p924_p5 = scmp.lt.u32.totalorder %s922_s16, %s917_s8 }
  0x2b   : > { %p926_p6 = scmp.lt.u32.totalorder %s917_s8, %s1351_s12 }
  0x2c   : > { %p920_p0 = pnand %p919_p13, %p918_p12  ;;  %p925_p8 = por %p924_p5, %p923_p3 }
  0x2e   : > { %p921_p1 = pneg %p920_p0  ;;  %p927_p2 = por %p926_p6, %p925_p8 }
  0x30   : > { %p928_p4 = pnand %p927_p2, %p921_p1 }
  0x32   : > { %931 = shalt.err (!%p928_p4)
}
  0x33   : > { %s932_s10 = scalar_lea.vmem %s1355_s9, 256  ;;  %s1205_s30 = smov [#allocation7]  }
  0x34   : > { %p933_p12 = scmp.ne.s32.totalorder %s1355_s9, %s932_s10  ;;  %s937_s11 = sshll.u32 %s1205_s30, 4  ;;  %s938_s11 = int_to_ptr.vmem [resolvable:$false] %s937_s11 }
  0x35   : > { %s939_s26 = scalar_lea.vmem %s938_s11, 512  ;;  %p940_p11 = scmp.lt.s32.totalorder %s1355_s9, %s938_s11 }
  0x36   : > { %p935_p0 = pnand %p933_p12, %p919_p13  ;;  %p941_p3 = scmp.lt.s32.totalorder %s939_s26, %s932_s10 }
  0x38   : > { %p936_p10 = pneg %p935_p0  ;;  %p942_p5 = por %p941_p3, %p940_p11 }
  0x3a   : > { %p943_p6 = pnand %p942_p5, %p936_p10 }
  0x3c   : > { %946 = shalt.err (!%p943_p6)
}
  0x3d   : > { %s1734_s16 = smov 128   ;;  %s1735_s8 = smov 8  }
  0x3e   : > { %808 = dma.hbm_to_vmem [thread:$0]  (!%p1338_p9), %s1351_s12, 256, %s1355_s9, %s1358_s29, %s1734_s16, %s1734_s16, %s1735_s8  }
  0x3f   : > { %p1753_p2 = scmp.lt.s32.totalorder %s1203_s28, 5  ;;  %p1754_p4 = scmp.ge.s32.totalorder %s1203_s28, 1 }
  0x40   : > { %s1756_s10 = sshll.u32 %s1305_s7, 8  ;;  %s1757_s0 = sld [smem:[#allocation27_spill]] }
  0x41   : > { %p1393_p10 = pnand %p1754_p4, %p1753_p2  ;;  %s229_s1 = scalar_lea.vmem [#allocation4], %s1333_s15 }
  0x42   : > { %s238_s6 = sshll.u32 %s229_s1, 4  ;;  %s1758_s9 = sand.u32 1, %s1183_s23   ;;  %s1405_s6 = int_to_ptr.vmem [resolvable:$true] %s238_s6 }
  0x43   : > { %s1755_s14 = scalar_select %p1393_p10, 1, 0 }
  0x44   : > { %s1409_s12 = scalar_lea.sflag [#allocation5], %s1758_s9 }
  0x46   : > { %s1402_s26 = scalar_lea.hbm %s1757_s0, %s1756_s10  ;;  %s952_s30 = scalar_lea.hbm %s1757_s0, 1024 }
  0x47   : > { %s947_s16 = scalar_lea.hbm %s1402_s26, 256  ;;  %p953_p12 = scmp.lt.u32.totalorder %s1402_s26, %s1757_s0 }
  0x48   : > { %p948_p11 = scmp.ne.s32.totalorder %s1402_s26, %s947_s16  ;;  %p954_p0 = scmp.lt.u32.totalorder %s952_s30, %s947_s16 }
  0x49   : > { %p956_p5 = scmp.lt.u32.totalorder %s947_s16, %s1402_s26 }
  0x4a   : > { %p950_p1 = pnand %p948_p11, %p919_p13  ;;  %p955_p3 = por %p954_p0, %p953_p12 }
  0x4c   : > { %p951_p8 = pneg %p950_p1  ;;  %p957_p6 = por %p956_p5, %p955_p3 }
  0x4e   : > { %p958_p2 = pnand %p957_p6, %p951_p8 }
  0x50   : > { %961 = shalt.err (!%p958_p2)
}
  0x51   : > { %s962_s1 = scalar_lea.vmem %s1405_s6, 256  ;;  %s1208_s15 = smov [#allocation4]  }
  0x52   : > { %p963_p4 = scmp.ne.s32.totalorder %s1405_s6, %s962_s1  ;;  %s967_s9 = sshll.u32 %s1208_s15, 4  ;;  %s968_s9 = int_to_ptr.vmem [resolvable:$false] %s967_s9 }
  0x53   : > { %s969_s8 = scalar_lea.vmem %s968_s9, 512  ;;  %p970_p10 = scmp.lt.s32.totalorder %s1405_s6, %s968_s9 }
  0x54   : > { %p965_p11 = pnand %p963_p4, %p919_p13  ;;  %p971_p12 = scmp.lt.s32.totalorder %s969_s8, %s962_s1 }
  0x56   : > { %p966_p1 = pneg %p965_p11  ;;  %p972_p0 = por %p971_p12, %p970_p10 }
  0x58   : > { %p973_p3 = pnand %p972_p0, %p966_p1 }
  0x5a   : > { %976 = shalt.err (!%p973_p3)
}
  0x5b   : > { %s1759_s16 = smov 8   ;;  %s1760_s7 = smov 128  }
  0x5c   : > { %805 = dma.hbm_to_vmem [thread:$0]  (!%p1338_p9), %s1402_s26, 256, %s1405_s6, %s1409_s12, %s1760_s7, %s1760_s7, %s1759_s16  }
  0x5d   : > { %s1439_s17 = sadd.s32 4294967295, %s1203_s28   ;;  %s753_s10 = sadd.s32 4294967294, %s1203_s28  }
  0x5e   : > { %p68_p13 = scmp.eq.s32.totalorder %s1439_s17, 0  ;;  %s110_s30 = sadd.s32 1, %s1171_s20 }
  0x5f   : > { %s1447_s11 = scalar_select %p1326_p7, %s1171_s20, %s110_s30  }
  0x60   : > { %p1762_p10 = scmp.ne.s32.totalorder %s1179_s22, %s1175_s21  ;;  %p117_p9 = scmp.ne.s32.totalorder %s1171_s20, %s1167_s19 }
  0x61   : > { %1761 = sst [smem:[#allocation26_spill]] %s1447_s11  ;;  %p123_p5 = scmp.ne.s32.totalorder %s1167_s19, %s1163_s18 }
  0x62   : > { %p1452_p8 = por %p68_p13, %p1762_p10  ;;  %p173_p6 = scmp.eq.s32.totalorder %s1439_s17, 3 }
  0x63   : > { %p1764_p2 = scmp.eq.s32.totalorder %s1203_s28, 0  ;;  %p179_p11 = scmp.eq.s32.totalorder %s753_s10, 3 }
  0x64   : > { %s1763_s1 = scalar_select %p1452_p8, 1, 0 }
  0x65   : > { %p119_p4 = por %p117_p9, %p1764_p2  ;;  %p1463_p1 = por %p123_p5, %p68_p13 }
  0x66   : > { %p1467_p12 = por %p173_p6, %p117_p9  ;;  %p1471_p7 = por %p179_p11, %p123_p5 }
  0x67   : > { %s1765_s6 = scalar_select %p1463_p1, 1, 0 }
  0x68   : > { %s1766_s13 = scalar_select %p1467_p12, 1, 0 }
  0x69   : > { %s1767_s21 = scalar_select %p1471_p7, 1, 0 }
  0x6a   : > { %s1736_s26 = sand.u32 1, %s1171_s20   ;;  %s1737_s15 = sshll.u32 %s1199_s27, 7 }
  0x6b   : > { %s1478_s12 = sshll.u32 %s1736_s26, 3  ;;  %s1768_s2 = sld [smem:[#allocation29_spill]] }
  0x6c   : > { %s275_s7 = scalar_lea.vmem [#allocation9], %s1478_s12  ;;  %p1769_p0 = scmp.lt.s32.totalorder %s1203_s28, 4 }
  0x6d   : > { %s282_s10 = sshll.u32 %s275_s7, 4  ;;  %s283_s10 = int_to_ptr.vmem [resolvable:$true] %s282_s10 }
  0x6e   : > { %p1491_p3 = pnand %p1769_p0, %p119_p4 }
  0x70   : > { %p979_p10 = pneg %p1491_p3 }
  0x71   : > { %s1486_s16 = scalar_lea.hbm %s1768_s2, %s1737_s15  ;;  %s982_s7 = scalar_lea.hbm %s1768_s2, 256 }
  0x72   : > { %s977_s26 = scalar_lea.hbm %s1486_s16, 128  ;;  %p983_p6 = scmp.lt.u32.totalorder %s1486_s16, %s1768_s2 }
  0x73   : > { %p978_p13 = scmp.ne.s32.totalorder %s1486_s16, %s977_s26  ;;  %p984_p2 = scmp.lt.u32.totalorder %s982_s7, %s977_s26 }
  0x74   : > { %p986_p11 = scmp.lt.u32.totalorder %s977_s26, %s1486_s16 }
  0x75   : > { %p980_p9 = pnand %p979_p10, %p978_p13  ;;  %p985_p4 = por %p984_p2, %p983_p6 }
  0x77   : > { %p981_p5 = pneg %p980_p9  ;;  %p987_p0 = por %p986_p11, %p985_p4 }
  0x79   : > { %p988_p7 = pnand %p987_p0, %p981_p5 }
  0x7b   : > { %991 = shalt.err (!%p988_p7)
}
  0x7c   : > { %s992_s23 = scalar_lea.vmem %s283_s10, 128  ;;  %s1209_s11 = smov [#allocation9]  }
  0x7d   : > { %p993_p12 = scmp.ne.s32.totalorder %s283_s10, %s992_s23  ;;  %s997_s9 = sshll.u32 %s1209_s11, 4  ;;  %s998_s9 = int_to_ptr.vmem [resolvable:$false] %s997_s9 }
  0x7e   : > { %s999_s8 = scalar_lea.vmem %s998_s9, 256  ;;  %p1000_p1 = scmp.lt.s32.totalorder %s283_s10, %s998_s9 }
  0x7f   : > { %p995_p13 = pnand %p993_p12, %p979_p10  ;;  %p1001_p8 = scmp.lt.s32.totalorder %s999_s8, %s992_s23 }
  0x81   : > { %p996_p9 = pneg %p995_p13  ;;  %p1002_p2 = por %p1001_p8, %p1000_p1 }
  0x83   : > { %p1003_p6 = pnand %p1002_p2, %p996_p9 }
  0x85   : > { %1006 = shalt.err (!%p1003_p6)
}
  0x86   : > { %811 = dma.hbm_to_vmem [thread:$0]  (!%p1491_p3), %s1486_s16, 128, %s283_s10, %s1358_s29  }
  0x87   : > { %s1771_s0 = sshll.u32 %s1199_s27, 7  ;;  %s293_s23 = scalar_lea.vmem [#allocation10], %s1478_s12 }
  0x88   : > { %s1522_s11 = scalar_lea.hbm %s1724_s3, %s1771_s0  ;;  %s300_s7 = sshll.u32 %s293_s23, 4  ;;  %s301_s7 = int_to_ptr.vmem [resolvable:$true] %s300_s7 }
  0x89   : > { %s1772_s9 = sand.u32 1, %s1171_s20   ;;  %s1007_s2 = scalar_lea.hbm %s1522_s11, 128 }
  0x8a   : > { %s290_s8 = scalar_lea.sflag [#allocation11], %s1772_s9  ;;  %p1008_p8 = scmp.ne.s32.totalorder %s1522_s11, %s1007_s2 }
  0x8b   : > { %s1012_s10 = scalar_lea.hbm %s1724_s3, 256  ;;  %p1013_p7 = scmp.lt.u32.totalorder %s1522_s11, %s1724_s3 }
  0x8c   : > { %p1010_p1 = pnand %p1008_p8, %p979_p10  ;;  %p1014_p5 = scmp.lt.u32.totalorder %s1012_s10, %s1007_s2 }
  0x8d   : > { %p1016_p11 = scmp.lt.u32.totalorder %s1007_s2, %s1522_s11 }
  0x8e   : > { %p1011_p12 = pneg %p1010_p1  ;;  %p1015_p4 = por %p1014_p5, %p1013_p7 }
  0x90   : > { %p1017_p0 = por %p1016_p11, %p1015_p4 }
  0x92   : > { %p1018_p13 = pnand %p1017_p0, %p1011_p12 }
  0x94   : > { %1021 = shalt.err (!%p1018_p13)
}
  0x95   : > { %s1022_s12 = scalar_lea.vmem %s301_s7, 128  ;;  %s1210_s15 = smov [#allocation10]  }
  0x96   : > { %p1023_p9 = scmp.ne.s32.totalorder %s301_s7, %s1022_s12  ;;  %s1027_s23 = sshll.u32 %s1210_s15, 4  ;;  %s1028_s23 = int_to_ptr.vmem [resolvable:$false] %s1027_s23 }
  0x97   : > { %s1029_s9 = scalar_lea.vmem %s1028_s23, 256  ;;  %p1030_p8 = scmp.lt.s32.totalorder %s301_s7, %s1028_s23 }
  0x98   : > { %p1025_p2 = pnand %p1023_p9, %p979_p10  ;;  %p1031_p1 = scmp.lt.s32.totalorder %s1029_s9, %s1022_s12 }
  0x9a   : > { %p1026_p6 = pneg %p1025_p2  ;;  %p1032_p5 = por %p1031_p1, %p1030_p8 }
  0x9c   : > { %p1033_p7 = pnand %p1032_p5, %p1026_p6 }
  0x9e   : > { %1036 = shalt.err (!%p1033_p7)
}
  0x9f   : > { %814 = dma.hbm_to_vmem [thread:$0]  (!%p1491_p3), %s1522_s11, 128, %s301_s7, %s290_s8  }
  0xa0   : > { %p1773_p12 = scmp.ne.s32.totalorder %s1755_s14, 0 }
  0xa1   : > { %s311_s2 = sand.u32 (!%p1773_p12), 1, %s1179_s22   ;;  %p1774_p10 = scmp.ne.s32.totalorder (!%p1773_p12), %s1763_s1, 0 }
  0xa2   : > { %309 = sbr.rel (%p1773_p12) target bundleno = 410 (0x19a), region = 36  ;;  %s773_s29 = sshll.u32 (!%p1773_p12), %s311_s2, 4 }
  0xa3   : > { %s312_s16 = scalar_lea.sflag (!%p1773_p12), [#allocation5], %s311_s2  ;;  %s315_s10 = scalar_lea.vmem (!%p1773_p12), [#allocation4], %s773_s29 }
  0xa9   : > { %1138 = dma.done.wait (%p1774_p10), %s312_s16, 256  }
  0xaa   : > { %1140 = vsyncadd (%p1774_p10), %s312_s16, 4294967040  ;;  %s320_s0 = sand.u32 1, %s1439_s17   ;;  %s324_s26 = scalar_lea.vmem [#allocation7], %s773_s29 }
  0xab   : > { %s321_s30 = scalar_lea.sflag [#allocation8], %s320_s0 }
  0xac   : > { %1142 = dma.done.wait (%p1774_p10), %s321_s30, 256  }
  0xad   : > { %1144 = vsyncadd (%p1774_p10), %s321_s30, 4294967040  ;;  %s1559_s14 = sand.u32 1, %s1167_s19   ;;  %p1775_p3 = scmp.ne.s32.totalorder %s1765_s6, 0 }
  0xae   : > { %s775_s11 = sshll.u32 %s1559_s14, 3 }
  0xaf   : > { %s333_s7 = scalar_lea.vmem [#allocation9], %s775_s11 }
  0xb0   : > { %1146 = dma.done.wait (%p1775_p3), %s321_s30, 128  }
  0xb1   : > { %1148 = vsyncadd (%p1775_p3), %s321_s30, 4294967168  ;;  %s339_s17 = scalar_lea.sflag [#allocation11], %s1559_s14  ;;  %s342_s8 = scalar_lea.vmem [#allocation10], %s775_s11 }
  0xb2   : > { %1150 = dma.done.wait (%p1775_p3), %s339_s17, 128  }
  0xb3   : > { %1152 = vsyncadd (%p1775_p3), %s339_s17, 4294967168  ;;  %s779_s1 = sshll.u32 %s1191_s25, 1  ;;  %v397_v0 = vld [vmem:[%s315_s10] sm:$0xff]  ;;  %v398_v1 = vld [vmem:[%s315_s10 + $0x8] sm:$0xff]  ;;  %s1585_s15 = scalar_lea.vmem [#allocation12], %s775_s11 }
  0xb4   : > { %s1573_s12 = sadd.s32 %s1187_s24, %s779_s1  ;;  %v1575_v2 = vld [vmem:[%s324_s26] sm:$0xff]  ;;  %v1577_v3 = vld [vmem:[%s324_s26 + $0x8] sm:$0xff]  ;;  %s1587_s6 = scalar_lea.vmem [#allocation13], %s775_s11 }
  0xb5   : > { %v1580_v4 = vsub.f32 %v1575_v2, %v397_v0  ;;  %v1583_v5 = vsub.f32 %v1577_v3, %v398_v1  ;;  %p780_p4 = scmp.ne.s32.totalorder %s1187_s24, 0 }
  0xb6   : > { %v409_v6 = vld [vmem:[%s342_s8] sm:$0x1] (!%p780_p4)  ;;  %v410_v7 = vld [vmem:[%s333_s7] sm:$0x1] (!%p780_p4)  ;;  %v1211_v8 = vmov (!%p780_p4), 0.0  }
  0xb7   : > { %406 = sbr.rel (%p780_p4) target bundleno = 190 (0xbe), region = 56  ;;  %407 = vst [vmem:[%s1585_s15] sm:$0xff] (!%p780_p4), %v1211_v8  ;;  %408 = vst [vmem:[%s1587_s6] sm:$0xff] (!%p780_p4), %v1211_v8  ;;  %v411_v9 = vsub.f32 (!%p780_p4), %v409_v6, %v410_v7  ;;  %v413_v10 = vld [vmem:[%s342_s8] sm:$0x1] (!%p780_p4) }
  0xb8   : > { %414 = vst [vmem:[#allocation3] sm:$0x1] (!%p780_p4), %v413_v10 }
  0xb9   : > { %412 = vst [vmem:[#allocation2] sm:$0x1] (!%p780_p4), %v411_v9 }
  0xbe PF: > { %vm421_vm0 = vcmask 1040384   ;;  %v422_v12 = vrot.slane %v1580_v4, 7  ;;  %v423_v13 = vrot.slane %v1583_v5, 7  ;;  %s1212_s24 = smov 16   ;;  %s1213_s23 = smov 8   ;;  %v468_v17 = vrot.slane %v1575_v2, 7 }
  0xbf   : > { %434 = vrot.lane.b32.xlu1 %v1580_v4, %s1212_s24  ;;  %v416_v14 = vld [vmem:[#allocation3] sm:$0x1]  ;;  %v469_v18 = vrot.slane %v1577_v3, 7  ;;  %vm440_vm1 = vcmask 130048   ;;  %vm457_vm2 = vcmask 64512   ;;  %v514_v47 = vld [vmem:[%s1585_s15] sm:$0xff] }
  0xc0   : > { %v415_v11 = vld [vmem:[#allocation2] sm:$0x1]  ;;  %418 = vst [vmem:[#allocation3 - $0x7] sm:$0x80] %v1577_v3  ;;  %v424_v16 = vsel %vm421_vm0, %v422_v12, %v423_v13  ;;  %v472_v20 = vsel %vm421_vm0, %v416_v14, %v468_v17  ;;  %p781_p11 = scmp.ne.s32.totalorder %s1573_s12, 0 }
  0xc1   : > { %417 = vst [vmem:[#allocation2 - $0x7] sm:$0x80] %v1583_v5  ;;  %v426_v15 = vsel %vm421_vm0, %v415_v11, %v422_v12  ;;  %v470_v19 = vsel %vm421_vm0, %v468_v17, %v469_v18  ;;  %v518_v6 = vld [vmem:[%s1587_s6] sm:$0xff]  ;;  %v526_v9 = vlaneseq (!%p781_p11) }
  0xc2   : > { %428 = vrot.lane.b32.xlu0 %v426_v15, %s1212_s24 }
  0xc3   : > { %436 = vrot.lane.b32.xlu1 %v1583_v5, %s1212_s24  ;;  %v527_v10 = vand.u32 (!%p781_p11), 127, %v526_v9 }
  0xc5   : > { %vm528_vm3 = vcmp.lt.s32.totalorder (!%p781_p11), %v527_v10, 8 }
  0xc6   : > { %430 = vrot.lane.b32.xlu0 %v424_v16, %s1212_s24 }
  0xc7   : > { %447 = vrot.lane.b32.xlu1 %v424_v16, %s1213_s23 }
  0xca   : > { %445 = vrot.lane.b32.xlu0 %v426_v15, %s1213_s23 }
  0xcb   : > { %453 = vrot.lane.b32.xlu1 %v1583_v5, %s1213_s23 }
  0xce   : > { %451 = vrot.lane.b32.xlu0 %v1580_v4, %s1213_s23 }
  0xcf   : > { %476 = vrot.lane.b32.xlu1 %v470_v19, %s1212_s24 }
  0xd2   : > { %474 = vrot.lane.b32.xlu0 %v472_v20, %s1212_s24 }
  0xd3   : > { %482 = vrot.lane.b32.xlu1 %v1577_v3, %s1212_s24 }
  0xd6   : > { %480 = vrot.lane.b32.xlu0 %v1575_v2, %s1212_s24 }
  0xd7   : > { %492 = vrot.lane.b32.xlu1 %v470_v19, %s1213_s23 }
  0xda   : > { %490 = vrot.lane.b32.xlu0 %v472_v20, %s1213_s23 }
  0xdb   : > { %498 = vrot.lane.b32.xlu1 %v1577_v3, %s1213_s23 }
  0xde   : > { %496 = vrot.lane.b32.xlu0 %v1575_v2, %s1213_s23 }
 0x131   : > { %v435_v21 = vpop.permute.xlu1 %434 }
 0x134   : > { %v429_v22 = vpop.permute.xlu0 %428 }
 0x135   : > { %v437_v23 = vpop.permute.xlu1 %436  ;;  %v441_v29 = vsel %vm440_vm1, %v429_v22, %v435_v21 }
 0x136   : > { %v443_v35 = vmul.f32 -0.8075, %v441_v29 }
 0x138   : > { %v431_v24 = vpop.permute.xlu0 %430 }
 0x139   : > { %v448_v25 = vpop.permute.xlu1 %447  ;;  %v442_v27 = vsel %vm440_vm1, %v431_v24, %v437_v23 }
 0x13a   : > { %v444_v31 = vmul.f32 -0.8075, %v442_v27 }
 0x13c   : > { %v446_v26 = vpop.permute.xlu0 %445 }
 0x13d   : > { %v454_v28 = vpop.permute.xlu1 %453 }
 0x13e   : > { %v459_v30 = vsel %vm457_vm2, %v448_v25, %v454_v28 }
 0x13f   : > { %v461_v32 = vmul.f32 -0.1, %v459_v30 }
 0x140   : > { %v452_v33 = vpop.permute.xlu0 %451 }
 0x141   : > { %v458_v34 = vsel %vm457_vm2, %v446_v26, %v452_v33  ;;  %v463_v36 = vadd.f32 %v461_v32, %v444_v31  ;;  %v477_v38 = vpop.permute.xlu1 %476 }
 0x142   : > { %v460_v37 = vmul.f32 -0.1, %v458_v34 }
 0x143   : > { %v465_v39 = vadd.f32 %v463_v36, %v1583_v5 }
 0x144   : > { %v462_v40 = vadd.f32 %v460_v37, %v443_v35  ;;  %v475_v41 = vpop.permute.xlu0 %474 }
 0x145   : > { %v483_v43 = vpop.permute.xlu1 %482  ;;  %v511_v44 = vmul.f32 %v465_v39, %v465_v39 }
 0x146   : > { %v464_v42 = vadd.f32 %v462_v40, %v1580_v4  ;;  %v487_v52 = vsel %vm440_vm1, %v477_v38, %v483_v43 }
 0x147   : > { %v489_v56 = vmul.f32 -0.8075, %v487_v52 }
 0x148   : > { %v510_v45 = vmul.f32 %v464_v42, %v464_v42  ;;  %v481_v46 = vpop.permute.xlu0 %480 }
 0x149   : > { %v493_v49 = vpop.permute.xlu1 %492  ;;  %v486_v54 = vsel %vm440_vm1, %v475_v41, %v481_v46 }
 0x14a   : > { %v515_v48 = vadd.f32 %v511_v44, %v510_v45  ;;  %v488_v60 = vmul.f32 -0.8075, %v486_v54  ;;  %v530_v12 = vsel (!%p781_p11), %vm528_vm3, %v510_v45, 0.0 }
 0x14c   : > { %v516_v50 = vadd.f32 %v515_v48, %v514_v47  ;;  %v491_v51 = vpop.permute.xlu0 %490 }
 0x14d   : > { %v499_v53 = vpop.permute.xlu1 %498 }
 0x14e   : > { %517 = vst [vmem:[%s1585_s15] sm:$0xff] %v516_v50  ;;  %v503_v55 = vsel %vm457_vm2, %v493_v49, %v499_v53 }
 0x14f   : > { %v505_v57 = vmul.f32 -0.1, %v503_v55 }
 0x150   : > { %v497_v58 = vpop.permute.xlu0 %496 }
 0x151   : > { %v502_v59 = vsel %vm457_vm2, %v491_v51, %v497_v58  ;;  %v507_v61 = vadd.f32 %v505_v57, %v489_v56 }
 0x152   : > { %v504_v62 = vmul.f32 -0.1, %v502_v59 }
 0x153   : > { %v509_v63 = vadd.f32 %v507_v61, %v1577_v3 }
 0x154   : > { %v506_v0 = vadd.f32 %v504_v62, %v488_v60 }
 0x155   : > { %v513_v4 = vmul.f32 %v509_v63, %v509_v63  ;;  %v529_v11 = vld [vmem:[%s1585_s15] sm:$0x1] (!%p781_p11) }
 0x156   : > { %v508_v1 = vadd.f32 %v506_v0, %v1575_v2  ;;  %v531_v13 = vsub.f32 (!%p781_p11), %v529_v11, %v530_v12 }
 0x158   : > { %v512_v5 = vmul.f32 %v508_v1, %v508_v1  ;;  %525 = sbr.rel (%p781_p11) target bundleno = 361 (0x169), region = 60  ;;  %532 = vst [vmem:[%s1585_s15] sm:$0x1] (!%p781_p11), %v531_v13 }
 0x15a   : > { %v519_v7 = vadd.f32 %v513_v4, %v512_v5  ;;  %v534_v2 = vsel (!%p781_p11), %vm528_vm3, %v512_v5, 0.0 }
 0x15c   : > { %v520_v8 = vadd.f32 %v519_v7, %v518_v6 }
 0x15e   : > { %521 = vst [vmem:[%s1587_s6] sm:$0xff] %v520_v8 }
 0x165   : > { %v533_v3 = vld [vmem:[%s1587_s6] sm:$0x1] }
 0x166   : > { %v535_v14 = vsub.f32 %v533_v3, %v534_v2 }
 0x168   : > { %536 = vst [vmem:[%s1587_s6] sm:$0x1] %v535_v14 }
 0x169 PF: > { %s784_s9 = sshll.u32 %s1191_s25, 7  ;;  %s556_s10 = sshll.u32 %s1585_s15, 4  ;;  %s557_s10 = int_to_ptr.vmem [resolvable:$true] %s556_s10 }
 0x16a   : > { %s1637_s16 = scalar_lea.hbm %s1725_s4, %s784_s9  ;;  %s538_s0 = scalar_lea.sflag [#allocation6], %s1559_s14 }
 0x16b   : > { %s1037_s30 = scalar_lea.vmem %s557_s10, 128  ;;  %p1776_p13 = scmp.ne.s32.totalorder %s1766_s13, 0 }
 0x16c   : > { %p1038_p0 = scmp.ne.s32.totalorder %s557_s10, %s1037_s30  ;;  %s1214_s26 = smov [#allocation12]  }
 0x16d   : > { %s1041_s11 = sshll.u32 %s1214_s26, 4  ;;  %s1042_s11 = int_to_ptr.vmem [resolvable:$false] %s1041_s11 }
 0x16e   : > { %p1039_p9 = pnand %p1038_p0, %p1776_p13  ;;  %s1043_s7 = scalar_lea.vmem %s1042_s11, 256 }
 0x16f   : > { %p1044_p6 = scmp.lt.s32.totalorder %s557_s10, %s1042_s11  ;;  %p1045_p8 = scmp.lt.s32.totalorder %s1043_s7, %s1037_s30 }
 0x170   : > { %p1040_p2 = pneg %p1039_p9 }
 0x171   : > { %p1046_p1 = por %p1045_p8, %p1044_p6 }
 0x173   : > { %p1047_p5 = pnand %p1046_p1, %p1040_p2 }
 0x175   : > { %1050 = shalt.err (!%p1047_p5)
}
 0x176   : > { %s1051_s17 = scalar_lea.hbm %s1637_s16, 128  ;;  %s1055_s12 = scalar_lea.hbm %s1725_s4, 256 }
 0x177   : > { %p1052_p7 = scmp.ne.s32.totalorder %s1637_s16, %s1051_s17  ;;  %p1056_p3 = scmp.lt.u32.totalorder %s1637_s16, %s1725_s4 }
 0x178   : > { %p1057_p4 = scmp.lt.u32.totalorder %s1055_s12, %s1051_s17  ;;  %p1059_p0 = scmp.lt.u32.totalorder %s1051_s17, %s1637_s16 }
 0x179   : > { %p1053_p12 = pnand %p1052_p7, %p1776_p13 }
 0x17a   : > { %p1058_p11 = por %p1057_p4, %p1056_p3 }
 0x17b   : > { %p1054_p10 = pneg %p1053_p12 }
 0x17c   : > { %p1060_p9 = por %p1059_p0, %p1058_p11 }
 0x17e   : > { %p1061_p2 = pnand %p1060_p9, %p1054_p10 }
 0x180   : > { %1064 = shalt.err (!%p1061_p2)
}
 0x181   : > { %798 = dma.vmem_to_hbm [thread:$0]  (%p1776_p13), %s557_s10, 128, %s1637_s16, %s538_s0  }
 0x182   : > { %s1663_s29 = scalar_lea.hbm %s1726_s5, %s784_s9  ;;  %s569_s30 = sshll.u32 %s1587_s6, 4  ;;  %s570_s30 = int_to_ptr.vmem [resolvable:$true] %s569_s30 }
 0x183   : > { %s543_s26 = scalar_lea.sflag [#allocation14], %s1559_s14  ;;  %s1065_s11 = scalar_lea.vmem %s570_s30, 128 }
 0x184   : > { %p1066_p6 = scmp.ne.s32.totalorder %s570_s30, %s1065_s11  ;;  %s1215_s7 = smov [#allocation13]  }
 0x185   : > { %s1069_s17 = sshll.u32 %s1215_s7, 4  ;;  %s1070_s17 = int_to_ptr.vmem [resolvable:$false] %s1069_s17 }
 0x186   : > { %p1067_p8 = pnand %p1066_p6, %p1776_p13  ;;  %s1071_s8 = scalar_lea.vmem %s1070_s17, 256 }
 0x187   : > { %p1072_p5 = scmp.lt.s32.totalorder %s570_s30, %s1070_s17  ;;  %p1073_p7 = scmp.lt.s32.totalorder %s1071_s8, %s1065_s11 }
 0x188   : > { %p1068_p1 = pneg %p1067_p8 }
 0x189   : > { %p1074_p12 = por %p1073_p7, %p1072_p5 }
 0x18b   : > { %p1075_p10 = pnand %p1074_p12, %p1068_p1 }
 0x18d   : > { %1078 = shalt.err (!%p1075_p10)
}
 0x18e   : > { %s1079_s25 = scalar_lea.hbm %s1663_s29, 128  ;;  %s1083_s9 = scalar_lea.hbm %s1726_s5, 256 }
 0x18f   : > { %p1080_p3 = scmp.ne.s32.totalorder %s1663_s29, %s1079_s25  ;;  %p1084_p0 = scmp.lt.u32.totalorder %s1663_s29, %s1726_s5 }
 0x190   : > { %p1085_p9 = scmp.lt.u32.totalorder %s1083_s9, %s1079_s25  ;;  %p1087_p6 = scmp.lt.u32.totalorder %s1079_s25, %s1663_s29 }
 0x191   : > { %p1081_p4 = pnand %p1080_p3, %p1776_p13 }
 0x192   : > { %p1086_p2 = por %p1085_p9, %p1084_p0 }
 0x193   : > { %p1082_p11 = pneg %p1081_p4 }
 0x194   : > { %p1088_p8 = por %p1087_p6, %p1086_p2 }
 0x196   : > { %p1089_p1 = pnand %p1088_p8, %p1082_p11 }
 0x198   : > { %1092 = shalt.err (!%p1089_p1)
}
 0x199   : > { %799 = dma.vmem_to_hbm [thread:$0]  (%p1776_p13), %s570_s30, 128, %s1663_s29, %s543_s26  }
 0x19a PF: > { %p823_p5 = scmp.ge.s32.totalorder %s1203_s28, 2  ;;  %s581_s0 = sand.u32 1, %s1163_s18  }
 0x19b   : > { %p1777_p7 = scmp.ne.s32.totalorder %s1767_s21, 0  ;;  %s582_s1 = scalar_lea.sflag [#allocation6], %s581_s0 }
 0x19d   : > { %p816_p12 = pnand %p823_p5, %p1777_p7 }
 0x19f   : > { %1154 = dma.done.wait (!%p816_p12), %s582_s1, 128  }
 0x1a0   : > { %1156 = vsyncadd (!%p816_p12), %s582_s1, 4294967168  ;;  %s591_s12 = scalar_lea.sflag [#allocation14], %s581_s0 }
 0x1a1   : > { %1158 = dma.done.wait (!%p816_p12), %s591_s12, 128  }
 0x1a2   : > { %1160 = vsyncadd (!%p816_p12), %s591_s12, 4294967168  ;;  %s31_s28 = sadd.s32 1, %s1203_s28   ;;  %s1778_s13 = sld [smem:[#allocation26_spill]] }
 0x1a3   : > { %p28_p10 = scmp.ge.s32.totalorder %s31_s28, 6   ;;  %s1779_s15 = sld [smem:[#allocation21_spill]] }
 0x1a4   : > { %s1780_s23 = sld [smem:[#allocation25_spill]]  ;;  %s1781_s24 = sld [smem:[#allocation22_spill]] }
 0x1a5   : > { %s1782_s26 = sld [smem:[#allocation23_spill]]  ;;  %s1783_s2 = sld [smem:[#allocation24_spill]] }
 0x1a6   : > { %s1784_s18 = smov %s1167_s19  ;;  %s1785_s19 = smov %s1171_s20 }
 0x1a7   : > { %s1787_s21 = smov %s1179_s22  ;;  %s1789_s25 = smov %s1199_s27 }
 0x1a8   : > { %s1786_s20 = smov %s1778_s13  ;;  %30 = sbr.rel (!%p28_p10) target bundleno = 19 (0x13), region = 143 }
 0x1a9   : > { %s1788_s22 = smov %s1779_s15 }
 0x1ab   : > { %s1790_s27 = smov %s1783_s2 }
 0x1af   :  { %596 = vsyncpa [#allocation5], 1 }
 0x1b0   :  { %598 = vsyncpa [#allocation5 + $0x1], 1 }
 0x1b1   :  { %599 = vsyncpa [#allocation8], 1 }
 0x1b2   :  { %601 = vsyncpa [#allocation8 + $0x1], 1 }
 0x1b3   :  { %602 = vsyncpa [#allocation11], 1 }
 0x1b4   :  { %604 = vsyncpa [#allocation11 + $0x1], 1 }
 0x1b5   :  { %605 = vsyncpa [#allocation6], 1 }
 0x1b6   :  { %607 = vsyncpa [#allocation6 + $0x1], 1 }
 0x1b7   :  { %608 = vsyncpa [#allocation14], 1 }
 0x1b8   :  { %610 = vsyncpa [#allocation14 + $0x1], 1 }

</bundles_post_ra>
